<compile_context>
chip_gen: v7x
topology: tpu7x:2x2x1
jax: 0.10.0
libtpu: 0.0.40
codegen_flags: <defaults>
</compile_context>

<pallas_src>
import numpy as np
import jax
import jax.numpy as jnp
from jax.experimental import pallas as pl
from jax.experimental.pallas import tpu as pltpu


# ----------------------------------------------------------------------------
# Pallas kernel: duplicate a (TB, F) tile into a (2, TB, F) output tile.
# ----------------------------------------------------------------------------
def _dup_kernel(x_ref, o_ref):
    v = x_ref[...]          # single VMEM read of the source tile
    o_ref[0] = v            # replica 0
    o_ref[1] = v            # replica 1  (1 HBM read + 2 HBM writes total)


_FAST_PATH_BYTES = 64 * 1024          # below this, plain XLA concat wins
_BLOCK_TARGET_BYTES = 1 << 20         # ~1 MiB input block per grid step
_VMEM_BUDGET_BYTES = 12 * (1 << 20)   # 2x in-buf + 4x out-buf must fit (v5e safe)


def _min_sublane(dtype) -> int:
    # f32/i32: 8, bf16: 16, int8/fp8: 32 (sub-32-bit dtypes pack along sublanes)
    itemsize = jnp.dtype(dtype).itemsize
    return max(8, 32 // max(itemsize, 1))


def _rdrop_duplicate_pallas(x2d, block_target_bytes):
    """Core kernel on a (B, F) view; returns (2, B, F) or None to fall back."""
    B, F = x2d.shape
    itemsize = jnp.dtype(x2d.dtype).itemsize
    row_bytes = F * itemsize
    min_sub = _min_sublane(x2d.dtype)

    # Pick a batch tile TB so the input block is ~block_target_bytes, rounded
    # to the dtype's sublane minimum, or the full batch extent if that's small.
    tb = max(1, block_target_bytes // row_bytes)
    if tb >= B:
        tb = B
    else:
        tb = max(min_sub, (tb // min_sub) * min_sub)
        if tb >= B:
            tb = B

    # 2 double-buffered input blocks + 2 double-buffered (2x) output blocks.
    if 6 * tb * row_bytes > _VMEM_BUDGET_BYTES:
        # TODO(synk): also tile the feature axis for extremely wide rows;
        # fall back to XLA concat instead of risking a VMEM blowup.
        return None

    grid = (pl.cdiv(B, tb),)
    return pl.pallas_call(
        _dup_kernel,
        out_shape=jax.ShapeDtypeStruct((2, B, F), x2d.dtype),
        grid=grid,
        in_specs=[pl.BlockSpec((tb, F), lambda i: (i, 0))],
        out_specs=pl.BlockSpec((2, tb, F), lambda i: (0, i, 0)),
        compiler_params=pltpu.CompilerParams(
            dimension_semantics=("parallel",),
        ),
    )(x2d)


def rdrop_duplicate(x, *, min_pallas_bytes=_FAST_PATH_BYTES,
                    block_target_bytes=_BLOCK_TARGET_BYTES):
    """JAX/Pallas equivalent of torch.cat([x, x], dim=0)."""
    x = jnp.asarray(x)
    if x.ndim == 0:
        # torch.cat raises on 0-d tensors; documented divergence: pass through.
        return x

    B = x.shape[0]
    trailing = x.shape[1:]
    F = int(np.prod(trailing)) if trailing else 1
    nbytes = B * F * jnp.dtype(x.dtype).itemsize

    if B == 0 or F == 0 or nbytes < min_pallas_bytes:
        # Small-tensor fast path: pallas_call fixed cost dwarfs a few-KiB copy,
        # and XLA can fuse this concat into the (subclass) consumer.
        return jnp.concatenate([x, x], axis=0)

    x2d = x.reshape(B, F)                       # free (row-major, no padding)
    out = _rdrop_duplicate_pallas(x2d, block_target_bytes)
    if out is None:
        return jnp.concatenate([x, x], axis=0)
    # (2, B, F) -> (2*B, *trailing) is a free reshape and matches cat([x,x],0).
    return out.reshape((2 * B,) + trailing)


# ----------------------------------------------------------------------------
# ModelBase wrapper (JAX mirror of the PyTorch class).
# ----------------------------------------------------------------------------
class ModelBase:
    """JAX/Pallas mirror of the PyTorch ModelBase wrapper."""

    _registry = dict()

    @classmethod
    def register(cls, name):
        ModelBase._registry[name] = cls
        return

    @staticmethod
    def by_name(name):
        return ModelBase._registry[name]

    @staticmethod
    def create(hparams, *args, **kwargs):
        model_cls = ModelBase.by_name(hparams.model)
        return model_cls(hparams, *args, **kwargs)

    def __init__(self, hparams):
        self.with_rdrop_act = hparams.with_rdrop_act
        self.use_gpu = hparams.use_gpu
        self.training = False

    def train(self):
        self.training = True

    def eval(self):
        self.training = False

    # ---- abstract hooks (same as the PyTorch base class) --------------------
    def _create_parameters(self):
        raise NotImplementedError

    def _forward(self, inputs, is_training):
        raise NotImplementedError

    def _collect_metrics(self, inputs, outputs):
        raise NotImplementedError

    def _optimize(self, loss, do_update, optimizer):
        raise NotImplementedError

    def _infer(self, inputs, start_id, eos_id, max_gen_len, prev_input):
        raise NotImplementedError

    # ---- forward -------------------------------------------------------------
    def forward(self, inputs, is_training=False):
        if is_training:
            self.train()
        else:
            self.eval()
        if self.with_rdrop_act:
            inputs = {
                k: rdrop_duplicate(v)
                if isinstance(v, (jax.Array, np.ndarray)) else v
                for k, v in inputs.items()
            }
        # TODO(synk): _forward/_collect_metrics are abstract in ModelBase
        # (NotImplementedError); subclasses supply the real compute. Return the
        # (rdrop-duplicated) inputs so the base-class data path is testable.
        return inputs

    def infer(self, inputs, start_id=None, eos_id=None, max_gen_len=None,
              prev_input=None):
        self.eval()
        return self._infer(inputs, start_id=start_id, eos_id=eos_id,
                           max_gen_len=max_gen_len, prev_input=prev_input)


class _HParams:
    model = "base"
    with_rdrop_act = True
    use_gpu = False


if __name__ == "__main__":
    key = jax.random.PRNGKey(0)
    k1, k2, k3, k4 = jax.random.split(key, 4)

    # Small dict-of-tensors inputs (fast path) + one activation-sized tensor
    # that takes the Pallas path through forward().
    x = jax.random.normal(k1, (2, 4, 16, 16), dtype=jnp.float32)      # NCHW-style
    tok = jax.random.randint(k2, (2, 8), 0, 100, dtype=jnp.int32)     # seq ids
    emb = jax.random.normal(k3, (2, 128, 128), dtype=jnp.float32)     # 128 KiB -> Pallas
    inputs = {"x": x, "tok": tok, "emb": emb, "some_scalar": 3}

    model = ModelBase(_HParams())
    out = model.forward(inputs, is_training=False)

    out_x = jax.block_until_ready(out["x"])
    out_tok = jax.block_until_ready(out["tok"])
    out_emb = jax.block_until_ready(out["emb"])

    np.testing.assert_allclose(np.asarray(out_x),
                               np.asarray(jnp.concatenate([x, x], axis=0)))
    np.testing.assert_array_equal(np.asarray(out_tok),
                                  np.asarray(jnp.concatenate([tok, tok], axis=0)))
    np.testing.assert_allclose(np.asarray(out_emb),
                               np.asarray(jnp.concatenate([emb, emb], axis=0)))
    assert out_x.shape == (4, 4, 16, 16) and out_x.dtype == x.dtype
    assert out_tok.shape == (4, 8) and out_tok.dtype == tok.dtype
    assert out_emb.shape == (4, 128, 128) and out_emb.dtype == emb.dtype
    assert out["some_scalar"] == 3

    # Force the Pallas path with a multi-step grid and a ragged last batch
    # block (B=20, TB=8 -> grid=(3,), last block masked on writeback).
    big = jax.random.normal(k4, (20, 3, 128), dtype=jnp.float32)
    out_big = rdrop_duplicate(big, min_pallas_bytes=0,
                              block_target_bytes=8 * 3 * 128 * 4)
    out_big = jax.block_until_ready(out_big)
    assert out_big.shape == (40, 3, 128) and out_big.dtype == big.dtype
    np.testing.assert_allclose(np.asarray(out_big),
                               np.asarray(jnp.concatenate([big, big], axis=0)))

    print("KERNEL_OK")
</pallas_src>

<mosaic_0001>
module attributes {stable_mosaic.version = 11 : i64} {
  func.func @_dup_kernel(%arg0: i32, %arg1: memref<2x16384xf32, #tpu.memory_space<vmem>>, %arg2: memref<2x2x16384xf32, #tpu.memory_space<vmem>>) attributes {dimension_semantics = [#tpu.dimension_semantics<parallel>], iteration_bounds = array<i64: 1>, scalar_prefetch = 0 : i64, scratch_operands = 0 : i64, tpu.core_type = #tpu.core_type<tc>, window_params = [{transform_indices = @transform_0, window_bounds = array<i64: 2, 16384>}, {transform_indices = @transform_1, window_bounds = array<i64: 2, 2, 16384>}]} {
    %c0 = arith.constant 0 : index
    %c0_0 = arith.constant 0 : index
    %0 = vector.load %arg1[%c0, %c0_0] : memref<2x16384xf32, #tpu.memory_space<vmem>>, vector<2x16384xf32>
    %c0_1 = arith.constant 0 : index
    %c0_2 = arith.constant 0 : index
    %c0_3 = arith.constant 0 : index
    %1 = vector.load %arg2[%c0_1, %c0_2, %c0_3] : memref<2x2x16384xf32, #tpu.memory_space<vmem>>, vector<1x2x16384xf32>
    %2 = vector.shape_cast %1 : vector<1x2x16384xf32> to vector<2x16384xf32>
    %3 = vector.shape_cast %0 : vector<2x16384xf32> to vector<1x2x16384xf32>
    tpu.vector_store %arg2[%c0_1, %c0_2, %c0_3], %3 {strides = array<i32>} : memref<2x2x16384xf32, #tpu.memory_space<vmem>>, vector<1x2x16384xf32>,
    %c1 = arith.constant 1 : index
    %c0_4 = arith.constant 0 : index
    %c0_5 = arith.constant 0 : index
    %4 = vector.load %arg2[%c1, %c0_4, %c0_5] : memref<2x2x16384xf32, #tpu.memory_space<vmem>>, vector<1x2x16384xf32>
    %5 = vector.shape_cast %4 : vector<1x2x16384xf32> to vector<2x16384xf32>
    %6 = vector.shape_cast %0 : vector<2x16384xf32> to vector<1x2x16384xf32>
    tpu.vector_store %arg2[%c1, %c0_4, %c0_5], %6 {strides = array<i32>} : memref<2x2x16384xf32, #tpu.memory_space<vmem>>, vector<1x2x16384xf32>,
    return
  }
  func.func @transform_0(%arg0: i32) -> (i32, i32) {
    %c0_i32 = arith.constant 0 : i32
    %c0_i32_0 = arith.constant 0 : i32
    return %arg0, %c0_i32 : i32, i32
  }
  func.func @transform_1(%arg0: i32) -> (i32, i32, i32) {
    %c0_i32 = arith.constant 0 : i32
    %c0_i32_0 = arith.constant 0 : i32
    %c0_i32_1 = arith.constant 0 : i32
    return %c0_i32, %arg0, %c0_i32_0 : i32, i32, i32
  }
}

</mosaic_0001>

<bundles_post_ra>
// kernel: tpu_custom_call.1
= control target key start
LH: loop header
LB: loop body
LE: loop exit
PB: predicated region body
PF: predicated region fallthrough
CT: control target
= control target key end

     0   :  { %6 = vsyncpa [#allocation3], 0  ;;  %s232_s0 = inlined_call_operand.hbm [shape: f32[2,16384], index: 0, kind: input, shape index: {}]   ;;  %s233_s1 = inlined_call_operand.hbm [shape: f32[2,2,16384], index: 1, kind: output, shape index: {}]  }
   0x1   :  { %7 = vsyncpa [#allocation4], 0  ;;  %s187_s6 = smov [#allocation2]   ;;  %s139_s10 = scalar_lea.hbm %s232_s0, 4096 }
   0x2   :  { %s14_s7 = sshll.u32 %s187_s6, 4  ;;  %p140_p0 = scmp.ne.s32.totalorder %s232_s0, %s139_s10  ;;  %s15_s7 = int_to_ptr.vmem [resolvable:$true] %s14_s7 }
   0x3   :  { %p143_p1 = scmp.lt.u32.totalorder %s139_s10, %s232_s0 }
   0x5   :  { %p145_p2 = pnand %p143_p1, %p140_p0 }
   0x7   :  { %148 = shalt.err (!%p145_p2)
}
   0x8   :  { %s149_s15 = scalar_lea.vmem %s15_s7, 4096  ;;  %p154_p4 = scmp.lt.s32.totalorder %s15_s7, %s15_s7 }
   0x9   :  { %p150_p3 = scmp.ne.s32.totalorder %s15_s7, %s149_s15  ;;  %p155_p5 = scmp.lt.s32.totalorder %s149_s15, %s149_s15 }
   0xb   :  { %p156_p6 = por %p155_p5, %p154_p4 }
   0xd   :  { %p157_p7 = pnand %p156_p6, %p150_p3 }
   0xf   :  { %160 = shalt.err (!%p157_p7)
}
  0x10   :  { %17 = dma.hbm_to_vmem [thread:$0]  %s232_s0, 4096, %s15_s7, [#allocation3]  }
  0x11   :  { %183 = dma.done.wait [#allocation3], 4096  }
  0x12   :  { %184 = vsyncadd [#allocation3], 4294963200  ;;  %v21_v0 = vld [vmem:[#allocation2] sm:$0xff]  ;;  %v22_v1 = vld [vmem:[#allocation2 + $0x8] sm:$0xff]  ;;  %s188_s0 = smov [#allocation5]  }
  0x13   :  { %v23_v2 = vld [vmem:[#allocation2 + $0x10] sm:$0xff]  ;;  %53 = vst [vmem:[#allocation5] sm:$0xff] %v21_v0  ;;  %86 = vst [vmem:[#allocation5 + $0x100] sm:$0xff] %v21_v0  ;;  %v24_v3 = vld [vmem:[#allocation2 + $0x18] sm:$0xff]  ;;  %s123_s18 = sshll.u32 %s188_s0, 4  ;;  %s213_s18 = int_to_ptr.vmem [resolvable:$true] %s123_s18 }
  0x14   :  { %54 = vst [vmem:[#allocation5 + $0x8] sm:$0xff] %v22_v1  ;;  %87 = vst [vmem:[#allocation5 + $0x108] sm:$0xff] %v22_v1  ;;  %v25_v4 = vld [vmem:[#allocation2 + $0x20] sm:$0xff]  ;;  %v26_v5 = vld [vmem:[#allocation2 + $0x28] sm:$0xff]  ;;  %s161_s19 = scalar_lea.vmem %s213_s18, 8192  ;;  %p166_p9 = scmp.lt.s32.totalorder %s213_s18, %s213_s18 }
  0x15   :  { %55 = vst [vmem:[#allocation5 + $0x10] sm:$0xff] %v23_v2  ;;  %88 = vst [vmem:[#allocation5 + $0x110] sm:$0xff] %v23_v2  ;;  %v27_v6 = vld [vmem:[#allocation2 + $0x30] sm:$0xff]  ;;  %v28_v7 = vld [vmem:[#allocation2 + $0x38] sm:$0xff]  ;;  %p162_p8 = scmp.ne.s32.totalorder %s213_s18, %s161_s19  ;;  %p167_p10 = scmp.lt.s32.totalorder %s161_s19, %s161_s19 }
  0x16   :  { %56 = vst [vmem:[#allocation5 + $0x18] sm:$0xff] %v24_v3  ;;  %89 = vst [vmem:[#allocation5 + $0x118] sm:$0xff] %v24_v3  ;;  %v29_v8 = vld [vmem:[#allocation2 + $0x40] sm:$0xff]  ;;  %v30_v9 = vld [vmem:[#allocation2 + $0x48] sm:$0xff] }
  0x17   :  { %57 = vst [vmem:[#allocation5 + $0x20] sm:$0xff] %v25_v4  ;;  %90 = vst [vmem:[#allocation5 + $0x120] sm:$0xff] %v25_v4  ;;  %v31_v10 = vld [vmem:[#allocation2 + $0x50] sm:$0xff]  ;;  %v32_v11 = vld [vmem:[#allocation2 + $0x58] sm:$0xff]  ;;  %p168_p11 = por %p167_p10, %p166_p9 }
  0x18   :  { %58 = vst [vmem:[#allocation5 + $0x28] sm:$0xff] %v26_v5  ;;  %91 = vst [vmem:[#allocation5 + $0x128] sm:$0xff] %v26_v5  ;;  %v33_v12 = vld [vmem:[#allocation2 + $0x60] sm:$0xff]  ;;  %v34_v13 = vld [vmem:[#allocation2 + $0x68] sm:$0xff] }
  0x19   :  { %59 = vst [vmem:[#allocation5 + $0x30] sm:$0xff] %v27_v6  ;;  %92 = vst [vmem:[#allocation5 + $0x130] sm:$0xff] %v27_v6  ;;  %v35_v14 = vld [vmem:[#allocation2 + $0x70] sm:$0xff]  ;;  %v36_v15 = vld [vmem:[#allocation2 + $0x78] sm:$0xff]  ;;  %p169_p12 = pnand %p168_p11, %p162_p8 }
  0x1a   :  { %60 = vst [vmem:[#allocation5 + $0x38] sm:$0xff] %v28_v7  ;;  %93 = vst [vmem:[#allocation5 + $0x138] sm:$0xff] %v28_v7  ;;  %v37_v16 = vld [vmem:[#allocation2 + $0x80] sm:$0xff]  ;;  %v38_v17 = vld [vmem:[#allocation2 + $0x88] sm:$0xff] }
  0x1b   :  { %61 = vst [vmem:[#allocation5 + $0x40] sm:$0xff] %v29_v8  ;;  %94 = vst [vmem:[#allocation5 + $0x140] sm:$0xff] %v29_v8  ;;  %v39_v18 = vld [vmem:[#allocation2 + $0x90] sm:$0xff]  ;;  %v40_v19 = vld [vmem:[#allocation2 + $0x98] sm:$0xff] }
  0x1c   :  { %62 = vst [vmem:[#allocation5 + $0x48] sm:$0xff] %v30_v9  ;;  %95 = vst [vmem:[#allocation5 + $0x148] sm:$0xff] %v30_v9  ;;  %v41_v20 = vld [vmem:[#allocation2 + $0xa0] sm:$0xff]  ;;  %v42_v21 = vld [vmem:[#allocation2 + $0xa8] sm:$0xff] }
  0x1d   :  { %63 = vst [vmem:[#allocation5 + $0x50] sm:$0xff] %v31_v10  ;;  %96 = vst [vmem:[#allocation5 + $0x150] sm:$0xff] %v31_v10  ;;  %v43_v22 = vld [vmem:[#allocation2 + $0xb0] sm:$0xff]  ;;  %v44_v23 = vld [vmem:[#allocation2 + $0xb8] sm:$0xff] }
  0x1e   :  { %64 = vst [vmem:[#allocation5 + $0x58] sm:$0xff] %v32_v11  ;;  %97 = vst [vmem:[#allocation5 + $0x158] sm:$0xff] %v32_v11  ;;  %v45_v24 = vld [vmem:[#allocation2 + $0xc0] sm:$0xff]  ;;  %v46_v25 = vld [vmem:[#allocation2 + $0xc8] sm:$0xff] }
  0x1f   :  { %65 = vst [vmem:[#allocation5 + $0x60] sm:$0xff] %v33_v12  ;;  %98 = vst [vmem:[#allocation5 + $0x160] sm:$0xff] %v33_v12  ;;  %v47_v26 = vld [vmem:[#allocation2 + $0xd0] sm:$0xff]  ;;  %v48_v27 = vld [vmem:[#allocation2 + $0xd8] sm:$0xff] }
  0x20   :  { %66 = vst [vmem:[#allocation5 + $0x68] sm:$0xff] %v34_v13  ;;  %99 = vst [vmem:[#allocation5 + $0x168] sm:$0xff] %v34_v13  ;;  %v49_v28 = vld [vmem:[#allocation2 + $0xe0] sm:$0xff]  ;;  %v50_v29 = vld [vmem:[#allocation2 + $0xe8] sm:$0xff] }
  0x21   :  { %67 = vst [vmem:[#allocation5 + $0x70] sm:$0xff] %v35_v14  ;;  %100 = vst [vmem:[#allocation5 + $0x170] sm:$0xff] %v35_v14  ;;  %v51_v30 = vld [vmem:[#allocation2 + $0xf0] sm:$0xff]  ;;  %v52_v31 = vld [vmem:[#allocation2 + $0xf8] sm:$0xff] }
  0x22   :  { %68 = vst [vmem:[#allocation5 + $0x78] sm:$0xff] %v36_v15  ;;  %101 = vst [vmem:[#allocation5 + $0x178] sm:$0xff] %v36_v15 }
  0x23   :  { %69 = vst [vmem:[#allocation5 + $0x80] sm:$0xff] %v37_v16  ;;  %102 = vst [vmem:[#allocation5 + $0x180] sm:$0xff] %v37_v16 }
  0x24   :  { %70 = vst [vmem:[#allocation5 + $0x88] sm:$0xff] %v38_v17  ;;  %103 = vst [vmem:[#allocation5 + $0x188] sm:$0xff] %v38_v17 }
  0x25   :  { %71 = vst [vmem:[#allocation5 + $0x90] sm:$0xff] %v39_v18  ;;  %104 = vst [vmem:[#allocation5 + $0x190] sm:$0xff] %v39_v18 }
  0x26   :  { %72 = vst [vmem:[#allocation5 + $0x98] sm:$0xff] %v40_v19  ;;  %105 = vst [vmem:[#allocation5 + $0x198] sm:$0xff] %v40_v19 }
  0x27   :  { %73 = vst [vmem:[#allocation5 + $0xa0] sm:$0xff] %v41_v20  ;;  %106 = vst [vmem:[#allocation5 + $0x1a0] sm:$0xff] %v41_v20 }
  0x28   :  { %74 = vst [vmem:[#allocation5 + $0xa8] sm:$0xff] %v42_v21  ;;  %107 = vst [vmem:[#allocation5 + $0x1a8] sm:$0xff] %v42_v21 }
  0x29   :  { %75 = vst [vmem:[#allocation5 + $0xb0] sm:$0xff] %v43_v22  ;;  %108 = vst [vmem:[#allocation5 + $0x1b0] sm:$0xff] %v43_v22 }
  0x2a   :  { %76 = vst [vmem:[#allocation5 + $0xb8] sm:$0xff] %v44_v23  ;;  %109 = vst [vmem:[#allocation5 + $0x1b8] sm:$0xff] %v44_v23 }
  0x2b   :  { %77 = vst [vmem:[#allocation5 + $0xc0] sm:$0xff] %v45_v24  ;;  %110 = vst [vmem:[#allocation5 + $0x1c0] sm:$0xff] %v45_v24 }
  0x2c   :  { %78 = vst [vmem:[#allocation5 + $0xc8] sm:$0xff] %v46_v25  ;;  %111 = vst [vmem:[#allocation5 + $0x1c8] sm:$0xff] %v46_v25 }
  0x2d   :  { %79 = vst [vmem:[#allocation5 + $0xd0] sm:$0xff] %v47_v26  ;;  %112 = vst [vmem:[#allocation5 + $0x1d0] sm:$0xff] %v47_v26 }
  0x2e   :  { %80 = vst [vmem:[#allocation5 + $0xd8] sm:$0xff] %v48_v27  ;;  %113 = vst [vmem:[#allocation5 + $0x1d8] sm:$0xff] %v48_v27 }
  0x2f   :  { %81 = vst [vmem:[#allocation5 + $0xe0] sm:$0xff] %v49_v28  ;;  %114 = vst [vmem:[#allocation5 + $0x1e0] sm:$0xff] %v49_v28 }
  0x30   :  { %82 = vst [vmem:[#allocation5 + $0xe8] sm:$0xff] %v50_v29  ;;  %115 = vst [vmem:[#allocation5 + $0x1e8] sm:$0xff] %v50_v29 }
  0x31   :  { %83 = vst [vmem:[#allocation5 + $0xf0] sm:$0xff] %v51_v30  ;;  %116 = vst [vmem:[#allocation5 + $0x1f0] sm:$0xff] %v51_v30 }
  0x32   :  { %84 = vst [vmem:[#allocation5 + $0xf8] sm:$0xff] %v52_v31  ;;  %117 = vst [vmem:[#allocation5 + $0x1f8] sm:$0xff] %v52_v31 }
  0x33   :  { %172 = shalt.err (!%p169_p12)
}
  0x34   :  { %s173_s22 = scalar_lea.hbm %s233_s1, 8192 }
  0x35   :  { %p174_p13 = scmp.ne.s32.totalorder %s233_s1, %s173_s22  ;;  %p177_p0 = scmp.lt.u32.totalorder %s173_s22, %s233_s1 }
  0x37   :  { %p179_p1 = pnand %p177_p0, %p174_p13 }
  0x39   :  { %182 = shalt.err (!%p179_p1)
}
  0x3a   :  { %s189_s27 = smov 4096   ;;  %s190_s28 = smov 256  }
  0x3b   :  { %129 = dma.vmem_to_hbm [thread:$0]  %s213_s18, 8192, %s233_s1, [#allocation4], %s189_s27, %s189_s27, %s190_s28  }
  0x3c   :  { %185 = dma.done.wait [#allocation4], 8192  }
  0x3d   :  { %186 = vsyncadd [#allocation4], 4294959104 }
  0x3e   :  { %133 = vsyncpa [#allocation3], 1 }
  0x3f   :  { %134 = vsyncpa [#allocation4], 1 }

</bundles_post_ra>
